<compile_context>
chip_gen: v7x
topology: tpu7x:2x2x1
jax: 0.10.0
libtpu: 0.0.40
codegen_flags: <defaults>
</compile_context>

<pallas_src>
import functools

import jax
import jax.numpy as jnp
from jax.experimental import pallas as pl
from jax.experimental.pallas import tpu as pltpu


# ----------------------------------------------------------------------------- kernel


def _token_attention_kernel(x_ref, w1_ref, b1_ref, w2_ref, b2_ref,
                            out_ref, scores_ref):
    tb, n, d = x_ref.shape
    x = x_ref[...]                                        # (TB, Np, D) bf16 or f32

    # Linear(D, D) on the MXU (bf16 fast path), f32 accumulation.  The reshapes are
    # layout-free: Np is padded to a multiple of 16 in the wrapper (sublane tile for
    # bf16; also a multiple of 8 for f32).
    h = jnp.dot(x.reshape(tb * n, d), w1_ref[...],
                preferred_element_type=jnp.float32)       # (TB*Np, D) f32
    h = h + b1_ref[...]
    h = h * jax.nn.sigmoid(h)                             # SiLU in f32 (VPU + EUP)

    # Linear(D, 1): VPU multiply + a SINGLE cross-lane reduce, reused for both the
    # score output and the weighted token sum (no duplicate XLU reduction).
    prod = h.reshape(tb, n, d) * w2_ref[...]              # w2 passed as a (1, D) row
    s_col = jnp.sum(prod, axis=-1, keepdims=True) + b2_ref[0]   # (TB, Np, 1) f32

    # outputs = scores @ x : weighted token sum as VPU multiply + sublane reduce in f32
    # (avoids an M=1 MXU matmul and any MRF/MRB drain).
    xf = x.astype(jnp.float32)
    out_ref[...] = jnp.sum(s_col * xf, axis=1).reshape(1, tb, d)

    # Lane-dense score store (one contiguous slab per grid step).
    scores_ref[...] = s_col.reshape(1, 1, tb * n)


# ------------------------------------------------------------------------ host helpers


def _cdiv(a, b):
    return -(-a // b)


def _round_up(a, b):
    return _cdiv(a, b) * b


def _vmem_capacity_bytes():
    try:
        cap = getattr(pltpu.get_tpu_info(), "vmem_capacity_bytes", None)
        if cap:
            return int(cap)
    except Exception:
        pass
    try:
        kind = jax.devices()[0].device_kind.lower()
        return 64 * 2 ** 20 if "v7" in kind else 128 * 2 ** 20
    except Exception:
        return 64 * 2 ** 20          # conservative (v7x) default


def _is_megacore():
    # Only parts with >1 TensorCore per chip benefit from an even, >=2 grid length.
    try:
        kind = jax.devices()[0].device_kind.lower()
    except Exception:
        return False
    if "lite" in kind:
        return False
    return ("v7" in kind) or ("v4" in kind) or ("v5p" in kind) or ("v5 p" in kind)


def _has_buffered():
    # Construction-time feature probe for BlockSpec(pipeline_mode=pl.Buffered(1)).
    try:
        pl.BlockSpec((8, 128), lambda i: (0, 0), pipeline_mode=pl.Buffered(1))
        return True
    except Exception:
        return False


_HAS_BUFFERED = _has_buffered()


def _vmem_estimate(tb, Np, D, xbytes):
    # Worst case: x + outputs + scores double-buffered, weights double-buffered,
    # plus live f32 intermediates (h, prod, upcast x).
    return (2 * tb * Np * D * xbytes
            + 2 * (D * D * xbytes + 2 * 4 * D)
            + 2 * (tb * D + tb * Np) * 4
            + 3 * tb * Np * D * 4)


def _choose_tiling(B, N, D, use_bf16, target_rows, vmem_cap, want_even_grid):
    Np = _round_up(N, 16)                       # sublane-safe for bf16 (16) and f32 (8)
    xbytes = 2 if use_bf16 else 4

    tb = max(1, target_rows // Np)              # ~512 matmul rows per grid step
    tb = min(tb, B)
    budget = int(0.6 * vmem_cap)
    while tb > 1 and _vmem_estimate(tb, Np, D, xbytes) > budget:
        tb -= 1
    # TODO(synk): for very large D on v7x (D*D*xbytes approaching the VMEM clamp), add a
    # second "arbitrary" grid axis over w1's contraction dim with an f32 accumulator.

    G = _cdiv(B, tb)
    if want_even_grid:
        if G == 1 and B > 1:
            tb = _cdiv(B, 2)                    # split the single tile across both TCs
            G = 2
        elif G > 1 and G % 2 == 1:
            G += 1                              # one dead (zero-padded) tile; sliced off
    Bp = G * tb

    est = _vmem_estimate(tb, Np, D, xbytes)
    vmem_limit = int(min(max(2 * est, 32 * 2 ** 20),
                         max(int(0.75 * vmem_cap), 32 * 2 ** 20)))
    return tb, Np, G, Bp, vmem_limit


def _build_pallas(Bp, Np, D, tb, G, single_buffer_weights, vmem_limit):
    # Grid-constant weights only need a single buffer (their block never changes).
    wkw = dict(pipeline_mode=pl.Buffered(1)) if single_buffer_weights else {}

    grid_spec = pltpu.PrefetchScalarGridSpec(
        num_scalar_prefetch=0,
        grid=(G,),
        in_specs=[
            pl.BlockSpec((tb, Np, D), lambda b: (b, 0, 0)),            # x
            pl.BlockSpec((D, D), lambda b: (0, 0), **wkw),             # w1
            pl.BlockSpec((1, D), lambda b: (0, 0), **wkw),             # b1 row
            pl.BlockSpec((1, D), lambda b: (0, 0), **wkw),             # w2 row
            pl.BlockSpec(memory_space=pltpu.MemorySpace.SMEM),         # b2 scalar
        ],
        out_specs=[
            pl.BlockSpec((1, tb, D), lambda b: (b, 0, 0)),             # outputs slab
            pl.BlockSpec((1, 1, tb * Np), lambda b: (b, 0, 0)),        # scores, lane-dense
        ],
    )

    return pl.pallas_call(
        _token_attention_kernel,
        out_shape=(
            jax.ShapeDtypeStruct((G, tb, D), jnp.float32),
            jax.ShapeDtypeStruct((G, 1, tb * Np), jnp.float32),
        ),
        grid_spec=grid_spec,
        compiler_params=pltpu.CompilerParams(
            dimension_semantics=("parallel",),   # batch tiles shard across TCs (v7x)
            vmem_limit_bytes=vmem_limit,
        ),
    )


@functools.lru_cache(maxsize=None)
def _build_fn(B, N, D, use_bf16, target_rows):
    vmem_cap = _vmem_capacity_bytes()
    tb, Np, G, Bp, vmem_limit = _choose_tiling(
        B, N, D, use_bf16, target_rows, vmem_cap, _is_megacore())
    in_dtype = jnp.bfloat16 if use_bf16 else jnp.float32

    def make(single_buffer_weights):
        call = _build_pallas(Bp, Np, D, tb, G, single_buffer_weights, vmem_limit)

        def fn(x, w1, b1, w2, b2):
            x = x.astype(jnp.float32)
            # Zero-padded tokens/batches contribute exactly 0 to outputs (x rows are 0);
            # their scores are sliced off below.
            xp = jnp.pad(x, ((0, Bp - B), (0, Np - N), (0, 0))).astype(in_dtype)
            w1c = w1.astype(in_dtype)
            b1r = jnp.reshape(b1, (1, D)).astype(jnp.float32)
            w2r = jnp.reshape(w2, (1, D)).astype(jnp.float32)   # (D,1) column -> (1,D) row
            b2s = jnp.reshape(b2, (1,)).astype(jnp.float32)

            out3, sflat = call(xp, w1c, b1r, w2r, b2s)
            outputs = jnp.reshape(out3, (Bp, D))[:B]
            scores = jnp.reshape(sflat, (Bp, Np))[:B, :N]
            return outputs, scores[:, None, :]                  # (B, D), (B, 1, N)

        return jax.jit(fn)

    probe_shapes = (
        jax.ShapeDtypeStruct((B, N, D), jnp.float32),
        jax.ShapeDtypeStruct((D, D), jnp.float32),
        jax.ShapeDtypeStruct((D,), jnp.float32),
        jax.ShapeDtypeStruct((D, 1), jnp.float32),
        jax.ShapeDtypeStruct((1,), jnp.float32),
    )
    if _HAS_BUFFERED:
        fn = make(True)
        try:
            fn.lower(*probe_shapes)   # trace + lower only; never executes in the try
            return fn
        except Exception:
            pass                      # Buffered(1) rejected at lowering -> default buffering
    return make(False)


def token_attention(x, w1, b1, w2, b2, *, use_bf16=True, target_rows=512):
    """x: (B, N, D); w1: (D, D); b1: (D,); w2: (D, 1); b2: (1,).

    Returns (outputs (B, D), scores (B, 1, N)) — same semantics as the PyTorch module.
    use_bf16 enables the bf16 MXU fast path (f32 accumulation); set False for exact f32.
    """
    B, N, D = x.shape
    fn = _build_fn(int(B), int(N), int(D), bool(use_bf16), int(target_rows))
    return fn(x, w1, b1, w2, b2)


def token_attention_ref(x, w1, b1, w2, b2):
    h = x @ w1 + b1
    h = h * jax.nn.sigmoid(h)
    s = h @ w2 + b2                                      # (B, N, 1)
    scores = jnp.transpose(s, (0, 2, 1))                 # (B, 1, N)
    outputs = jnp.squeeze(scores @ x, axis=1)            # (B, D)
    return outputs, scores


if __name__ == "__main__":
    B, N, D = 4, 8, 32

    key = jax.random.PRNGKey(0)
    kx, kw1, kb1, kw2, kb2 = jax.random.split(key, 5)

    x = jax.random.normal(kx, (B, N, D), dtype=jnp.float32)
    # Deterministic synthetic params (shapes match nn.Linear(D, D) and nn.Linear(D, 1)).
    w1 = jax.random.normal(kw1, (D, D), dtype=jnp.float32) * 0.1
    b1 = jax.random.normal(kb1, (D,), dtype=jnp.float32) * 0.1
    w2 = jax.random.normal(kw2, (D, 1), dtype=jnp.float32) * 0.1
    b2 = jax.random.normal(kb2, (1,), dtype=jnp.float32) * 0.1

    ref_out, ref_scores = token_attention_ref(x, w1, b1, w2, b2)

    # Exact f32 path: tight tolerances.
    out32, sc32 = token_attention(x, w1, b1, w2, b2, use_bf16=False)
    jax.block_until_ready((out32, sc32))
    assert out32.shape == (B, D) and sc32.shape == (B, 1, N)
    assert jnp.allclose(out32, ref_out, atol=1e-4, rtol=1e-4)
    assert jnp.allclose(sc32, ref_scores, atol=1e-5, rtol=1e-5)

    # bf16 MXU fast path (f32 accumulation): looser tolerances.
    out16, sc16 = token_attention(x, w1, b1, w2, b2, use_bf16=True)
    jax.block_until_ready((out16, sc16))
    assert out16.shape == (B, D) and sc16.shape == (B, 1, N)
    assert jnp.allclose(out16, ref_out, atol=5e-2, rtol=5e-2)
    assert jnp.allclose(sc16, ref_scores, atol=5e-2, rtol=5e-2)

    print("KERNEL_OK")
</pallas_src>

<mosaic_0001>
module attributes {stable_mosaic.version = 11 : i64} {
  func.func @_token_attention_kernel(%arg0: i32, %arg1: memref<4x16x32xf32, #tpu.memory_space<vmem>>, %arg2: memref<32x32xf32, #tpu.memory_space<vmem>>, %arg3: memref<1x32xf32, #tpu.memory_space<vmem>>, %arg4: memref<1x32xf32, #tpu.memory_space<vmem>>, %arg5: memref<1xf32, #tpu.memory_space<smem>>, %arg6: memref<1x4x32xf32, #tpu.memory_space<vmem>>, %arg7: memref<1x1x64xf32, #tpu.memory_space<vmem>>) attributes {dimension_semantics = [#tpu.dimension_semantics<parallel>], iteration_bounds = array<i64: 1>, scalar_prefetch = 0 : i64, scratch_operands = 0 : i64, tpu.core_type = #tpu.core_type<tc>, window_params = [{transform_indices = @transform_0, window_bounds = array<i64: 4, 16, 32>}, {pipeline_mode = #tpu.pipeline_mode<synchronous>, transform_indices = @transform_1, window_bounds = array<i64: 32, 32>}, {pipeline_mode = #tpu.pipeline_mode<synchronous>, transform_indices = @transform_2, window_bounds = array<i64: 1, 32>}, {pipeline_mode = #tpu.pipeline_mode<synchronous>, transform_indices = @transform_3, window_bounds = array<i64: 1, 32>}, {transform_indices = @transform_4, window_bounds = array<i64: 1>}, {transform_indices = @transform_5, window_bounds = array<i64: 1, 4, 32>}, {transform_indices = @transform_6, window_bounds = array<i64: 1, 1, 64>}]} {
    %c0 = arith.constant 0 : index
    %c0_0 = arith.constant 0 : index
    %c0_1 = arith.constant 0 : index
    %0 = vector.load %arg1[%c0, %c0_0, %c0_1] : memref<4x16x32xf32, #tpu.memory_space<vmem>>, vector<4x16x32xf32>
    %1 = vector.shape_cast %0 : vector<4x16x32xf32> to vector<64x32xf32>
    %c0_2 = arith.constant 0 : index
    %c0_3 = arith.constant 0 : index
    %2 = vector.load %arg2[%c0_2, %c0_3] : memref<32x32xf32, #tpu.memory_space<vmem>>, vector<32x32xf32>
    %cst = arith.constant dense<0.000000e+00> : vector<64x32xf32>
    %3 = tpu.matmul %1, %2, %cst {dimension_numbers = #tpu.dot_dimension_numbers<[1], [0], [0], [1], [0, 0, 1, 1], [], []>} : vector<64x32xf32>, vector<32x32xf32>, vector<64x32xf32> -> vector<64x32xf32>
    %c0_4 = arith.constant 0 : index
    %c0_5 = arith.constant 0 : index
    %4 = vector.load %arg3[%c0_4, %c0_5] : memref<1x32xf32, #tpu.memory_space<vmem>>, vector<1x32xf32>
    %5 = vector.broadcast %4 : vector<1x32xf32> to vector<64x32xf32>
    %6 = arith.addf %3, %5 : vector<64x32xf32>
    %7 = arith.negf %6 : vector<64x32xf32>
    %8 = math.exp %7 : vector<64x32xf32>
    %cst_6 = arith.constant 1.000000e+00 : f32
    %9 = vector.broadcast %cst_6 : f32 to vector<64x32xf32>
    %10 = arith.addf %9, %8 : vector<64x32xf32>
    %11 = arith.divf %9, %10 : vector<64x32xf32>
    %12 = arith.mulf %6, %11 : vector<64x32xf32>
    %13 = vector.shape_cast %12 : vector<64x32xf32> to vector<4x16x32xf32>
    %c0_7 = arith.constant 0 : index
    %c0_8 = arith.constant 0 : index
    %14 = vector.load %arg4[%c0_7, %c0_8] : memref<1x32xf32, #tpu.memory_space<vmem>>, vector<1x32xf32>
    %15 = vector.shape_cast %14 : vector<1x32xf32> to vector<1x1x32xf32>
    %16 = vector.broadcast %15 : vector<1x1x32xf32> to vector<4x16x32xf32>
    %17 = arith.mulf %13, %16 : vector<4x16x32xf32>
    %cst_9 = arith.constant dense<0.000000e+00> : vector<4x16xf32>
    %18 = vector.multi_reduction <add>, %17, %cst_9 [2] : vector<4x16x32xf32> to vector<4x16xf32>
    %19 = vector.shape_cast %18 : vector<4x16xf32> to vector<4x16x1xf32>
    %c0_10 = arith.constant 0 : index
    %20 = memref.load %arg5[%c0_10] : memref<1xf32, #tpu.memory_space<smem>>
    %21 = vector.broadcast %20 : f32 to vector<4x16x1xf32>
    %22 = arith.addf %19, %21 : vector<4x16x1xf32>
    %23 = vector.broadcast %22 : vector<4x16x1xf32> to vector<4x16x32xf32>
    %24 = arith.mulf %23, %0 : vector<4x16x32xf32>
    %cst_11 = arith.constant dense<0.000000e+00> : vector<4x32xf32>
    %25 = vector.multi_reduction <add>, %24, %cst_11 [1] : vector<4x16x32xf32> to vector<4x32xf32>
    %26 = vector.shape_cast %25 : vector<4x32xf32> to vector<1x4x32xf32>
    %c0_12 = arith.constant 0 : index
    %c0_13 = arith.constant 0 : index
    %c0_14 = arith.constant 0 : index
    %27 = vector.load %arg6[%c0_12, %c0_13, %c0_14] : memref<1x4x32xf32, #tpu.memory_space<vmem>>, vector<1x4x32xf32>
    tpu.vector_store %arg6[%c0_12, %c0_13, %c0_14], %26 {strides = array<i32>} : memref<1x4x32xf32, #tpu.memory_space<vmem>>, vector<1x4x32xf32>,
    %28 = vector.shape_cast %22 : vector<4x16x1xf32> to vector<1x1x64xf32>
    %c0_15 = arith.constant 0 : index
    %c0_16 = arith.constant 0 : index
    %c0_17 = arith.constant 0 : index
    %29 = vector.load %arg7[%c0_15, %c0_16, %c0_17] : memref<1x1x64xf32, #tpu.memory_space<vmem>>, vector<1x1x64xf32>
    tpu.vector_store %arg7[%c0_15, %c0_16, %c0_17], %28 {strides = array<i32>} : memref<1x1x64xf32, #tpu.memory_space<vmem>>, vector<1x1x64xf32>,
    return
  }
  func.func @transform_0(%arg0: i32) -> (i32, i32, i32) {
    %c0_i32 = arith.constant 0 : i32
    %c0_i32_0 = arith.constant 0 : i32
    %c0_i32_1 = arith.constant 0 : i32
    return %arg0, %c0_i32, %c0_i32_0 : i32, i32, i32
  }
  func.func @transform_1(%arg0: i32) -> (i32, i32) {
    %c0_i32 = arith.constant 0 : i32
    %c0_i32_0 = arith.constant 0 : i32
    %c0_i32_1 = arith.constant 0 : i32
    return %c0_i32, %c0_i32_0 : i32, i32
  }
  func.func @transform_2(%arg0: i32) -> (i32, i32) {
    %c0_i32 = arith.constant 0 : i32
    %c0_i32_0 = arith.constant 0 : i32
    %c0_i32_1 = arith.constant 0 : i32
    return %c0_i32, %c0_i32_0 : i32, i32
  }
  func.func @transform_3(%arg0: i32) -> (i32, i32) {
    %c0_i32 = arith.constant 0 : i32
    %c0_i32_0 = arith.constant 0 : i32
    %c0_i32_1 = arith.constant 0 : i32
    return %c0_i32, %c0_i32_0 : i32, i32
  }
  func.func @transform_4(%arg0: i32) -> i32 {
    %c0_i32 = arith.constant 0 : i32
    %c0_i32_0 = arith.constant 0 : i32
    return %c0_i32 : i32
  }
  func.func @transform_5(%arg0: i32) -> (i32, i32, i32) {
    %c0_i32 = arith.constant 0 : i32
    %c0_i32_0 = arith.constant 0 : i32
    %c0_i32_1 = arith.constant 0 : i32
    return %arg0, %c0_i32, %c0_i32_0 : i32, i32, i32
  }
  func.func @transform_6(%arg0: i32) -> (i32, i32, i32) {
    %c0_i32 = arith.constant 0 : i32
    %c0_i32_0 = arith.constant 0 : i32
    %c0_i32_1 = arith.constant 0 : i32
    return %arg0, %c0_i32, %c0_i32_0 : i32, i32, i32
  }
}

</mosaic_0001>

<bundles_post_ra>
// kernel: fn.1
= control target key start
LH: loop header
LB: loop body
LE: loop exit
PB: predicated region body
PF: predicated region fallthrough
CT: control target
= control target key end

     0   :  { %vm43_vm0 = vcmask 261120   ;;  %s725_s0 = inlined_call_operand.vmem [shape: f32[4,16,32], index: 0, kind: input, shape index: {}]   ;;  %s726_s1 = inlined_call_operand.vmem [shape: f32[32,32], index: 1, kind: input, shape index: {}]   ;;  %s727_s2 = inlined_call_operand.vmem [shape: f32[1,32], index: 2, kind: input, shape index: {}]   ;;  %s728_s3 = inlined_call_operand.vmem [shape: f32[1,32], index: 3, kind: input, shape index: {}]   ;;  %s729_s4 = inlined_call_operand.<no memory space> [shape: f32[1], index: 4, kind: input, shape index: {}]   ;;  %s730_s5 = inlined_call_operand.hbm [shape: f32[1,4,32], index: 5, kind: output, shape index: {0}]   ;;  %s731_s6 = inlined_call_operand.vmem [shape: f32[1,1,64], index: 6, kind: output, shape index: {1}]  }
   0x1   :  { %v32_v0 = vld [vmem:[%s726_s1] sm:$0xff]  ;;  %v33_v1 = vld [vmem:[%s726_s1 + $0x8] sm:$0xff]  ;;  %v34_v2 = vld [vmem:[%s726_s1 + $0x10] sm:$0xff] }
   0x2   :  { %v469_v3 = vpack.c.bf16 %v33_v1, %v32_v0  ;;  %v35_v4 = vld [vmem:[%s726_s1 + $0x18] sm:$0xff]  ;;  %v589_v5 = vld [vmem:[%s725_s0] sm:$0xff] }
   0x3   :  { %v594_v6 = vld [vmem:[%s725_s0 + $0x20] sm:$0xff]  ;;  %v473_v7 = vpack.c.bf16 %v35_v4, %v34_v2  ;;  %457 = vmatprep.mubr.msk.f32.mxu0 %vm43_vm0, %v589_v5 }
   0x4   :  { %463 = vmatprep.mubr.msk.f32.mxu1 %vm43_vm0, %v594_v6  ;;  %470 = vmatprep.subr.bf16.mxu0 %v469_v3 }
   0x5   :  { %477 = vmatprep.subr.bf16.mxu1 %v469_v3  ;;  %472 = vmatpush3.bf16.msra.mxu0 %v469_v3 }
   0x6   :  { %479 = vmatpush3.bf16.msra.mxu1 %v469_v3 }
   0x7   :  { %13 = vsyncpa [#allocation4], 0  ;;  %474 = vmatprep.subr.bf16.mxu0 %v473_v7  ;;  %478 = vmatprep.subr.bf16.mxu1 %v473_v7  ;;  %v603_v8 = vld [vmem:[%s725_s0 + $0x8] sm:$0xff]  ;;  %v613_v10 = vld [vmem:[%s725_s0 + $0x10] sm:$0xff]  ;;  %vm354_vm1 = vcmask 130112   ;;  %vm361_vm2 = vcmask 195712  }
   0x8   :  { %v608_v9 = vld [vmem:[%s725_s0 + $0x28] sm:$0xff]  ;;  %v618_v11 = vld [vmem:[%s725_s0 + $0x30] sm:$0xff]  ;;  %v631_v12 = vld [vmem:[%s725_s0 + $0x18] sm:$0xff]  ;;  %vm368_vm3 = vcmask 261312   ;;  %vm375_vm4 = vcmask 326912   ;;  %vm382_vm5 = vcmask 392512  }
   0x9   :  { %476 = vmatpush3.bf16.msra.mxu0 %v473_v7  ;;  %v636_v13 = vld [vmem:[%s725_s0 + $0x38] sm:$0xff]  ;;  %v419_v14 = vld [vmem:[%s727_s2] ss:$0 sm:$0xff]  ;;  %vm389_vm6 = vcmask 458112   ;;  %vm396_vm7 = vcmask 523712   ;;  %vm399_vm8 = vcmask 516096  }
   0xa   :  { %480 = vmatpush3.bf16.msra.mxu1 %v473_v7  ;;  %v436_v56 = vld [vmem:[%s728_s3] ss:$0 sm:$0xff]  ;;  %vm326_vm9 = vcmask 1041409   ;;  %vm328_vm10 = vcmask 1042434   ;;  %s538_s24 = smov [#allocation3]   ;;  %vm330_vm11 = vcmask 1043459  }
   0xb   :  { %s407_s25 = sshll.u32 %s538_s24, 4  ;;  %vm333_vm12 = vcmask 257024   ;;  %s408_s25 = int_to_ptr.vmem [resolvable:$true] %s407_s25 }
   0xc   :  { %458 = vmatmul.mubr.msk.f32.vlgmr.msra.gmra.mrb[0].mxu0 %vm43_vm0, %v603_v8  ;;  %p519_p1 = scmp.lt.s32.totalorder %s408_s25, %s408_s25 }
   0xd   :  { %464 = vmatmul.mubr.msk.f32.vlgmr.msra.gmra.mrb[0].mxu1 %vm43_vm0, %v608_v9  ;;  %460 = vmatprep.mubr.msk.f32.mxu0 %vm43_vm0, %v613_v10 }
   0xe   :  { %466 = vmatprep.mubr.msk.f32.mxu1 %vm43_vm0, %v618_v11 }
  0x10   :  { %461 = vmatmul.mubr.msk.f32.gmra.mrb[2].mxu0 %vm43_vm0, %v631_v12 }
  0x11   :  { %467 = vmatmul.mubr.msk.f32.gmra.mrb[2].mxu1 %vm43_vm0, %v636_v13 }
  0xdf   :  { %v459_v15 = vpop.f32.mrb[0].mxu0 }
  0xe0   :  { %v465_v16 = vpop.f32.mrb[0].mxu1  ;;  %v140_v17 = vadd.f32 %v459_v15, %v419_v14  ;;  %v134_v19 = vpop.f32.mrb[1].mxu0 }
  0xe1   :  { %v160_v18 = vadd.f32 %v465_v16, %v419_v14  ;;  %v154_v20 = vpop.f32.mrb[1].mxu1  ;;  %v135_v21 = vadd.f32 %v419_v14, %v134_v19 }
  0xe2   :  { %v155_v22 = vadd.f32 %v419_v14, %v154_v20  ;;  %v429_v23 = vmul.f32 -1.442695, %v140_v17 }
  0xe3   :  { %v433_v24 = vmul.f32 -1.442695, %v160_v18  ;;  %v428_v25 = vmul.f32 -1.442695, %v135_v21  ;;  %v462_v27 = vpop.f32.mrb[2].mxu0 }
  0xe4   :  { %v432_v26 = vmul.f32 -1.442695, %v155_v22  ;;  %v468_v28 = vpop.f32.mrb[2].mxu1  ;;  %482 = vpow2.f32 %v429_v23  ;;  %v150_v29 = vadd.f32 %v462_v27, %v419_v14  ;;  %v144_v31 = vpop.f32.mrb[3].mxu0 }
  0xe5   :  { %v645_v30 = vadd.f32 %v468_v28, %v419_v14  ;;  %v164_v32 = vpop.f32.mrb[3].mxu1  ;;  %484 = vpow2.f32 %v433_v24  ;;  %v145_v33 = vadd.f32 %v419_v14, %v144_v31 }
  0xe6   :  { %v165_v34 = vadd.f32 %v419_v14, %v164_v32  ;;  %486 = vpow2.f32 %v428_v25  ;;  %v431_v35 = vmul.f32 -1.442695, %v150_v29 }
  0xe7   :  { %v435_v36 = vmul.f32 -1.442695, %v645_v30  ;;  %488 = vpow2.f32 %v432_v26  ;;  %v430_v37 = vmul.f32 -1.442695, %v145_v33 }
  0xe8   :  { %v434_v38 = vmul.f32 -1.442695, %v165_v34  ;;  %490 = vpow2.f32 %v431_v35 }
  0xe9   :  { %492 = vpow2.f32 %v435_v36 }
  0xea   :  { %494 = vpow2.f32 %v430_v37 }
  0xeb   :  { %496 = vpow2.f32 %v434_v38 }
  0xee   :  { %v483_v39 = vpop.eup %482 }
  0xef   :  { %v485_v40 = vpop.eup %484  ;;  %v198_v41 = vadd.f32 1.0, %v483_v39 }
  0xf0   :  { %v487_v42 = vpop.eup %486  ;;  %v202_v43 = vadd.f32 1.0, %v485_v40 }
  0xf1   :  { %v489_v44 = vpop.eup %488  ;;  %498 = vrcp.f32 %v198_v41  ;;  %v197_v45 = vadd.f32 1.0, %v487_v42 }
  0xf2   :  { %v491_v46 = vpop.eup %490  ;;  %500 = vrcp.f32 %v202_v43  ;;  %v201_v47 = vadd.f32 1.0, %v489_v44 }
  0xf3   :  { %v493_v48 = vpop.eup %492  ;;  %502 = vrcp.f32 %v197_v45  ;;  %v200_v49 = vadd.f32 1.0, %v491_v46 }
  0xf4   :  { %v495_v50 = vpop.eup %494  ;;  %504 = vrcp.f32 %v201_v47  ;;  %v204_v51 = vadd.f32 1.0, %v493_v48 }
  0xf5   :  { %v497_v52 = vpop.eup %496  ;;  %506 = vrcp.f32 %v200_v49  ;;  %v199_v53 = vadd.f32 1.0, %v495_v50 }
  0xf6   :  { %508 = vrcp.f32 %v204_v51  ;;  %v203_v54 = vadd.f32 1.0, %v497_v52 }
  0xf7   :  { %510 = vrcp.f32 %v199_v53 }
  0xf8   :  { %512 = vrcp.f32 %v203_v54 }
  0xfb   :  { %v499_v55 = vpop.eup %498 }
  0xfc   :  { %v501_v57 = vpop.eup %500  ;;  %v222_v58 = vmul.f32 %v499_v55, %v140_v17 }
  0xfd   :  { %v503_v59 = vpop.eup %502  ;;  %v226_v60 = vmul.f32 %v501_v57, %v160_v18 }
  0xfe   :  { %v505_v61 = vpop.eup %504  ;;  %v221_v62 = vmul.f32 %v503_v59, %v135_v21  ;;  %v237_v63 = vmul.f32 %v436_v56, %v222_v58 }
  0xff   :  { %v507_v0 = vpop.eup %506  ;;  %v241_v1 = vmul.f32 %v436_v56, %v226_v60  ;;  %v225_v3 = vmul.f32 %v505_v61, %v155_v22 }
 0x100   :  { %v509_v2 = vpop.eup %508  ;;  %v224_v4 = vmul.f32 %v507_v0, %v150_v29  ;;  %v247_v7 = vsel %vm43_vm0, %v237_v63, 0.0  ;;  %v236_v14 = vmul.f32 %v436_v56, %v221_v62 }
 0x101   :  { %v511_v15 = vpop.eup %510  ;;  %v259_v16 = vsel %vm43_vm0, %v241_v1, 0.0  ;;  %248 = vadd.xlane.f32.xlu0 %v247_v7  ;;  %v240_v24 = vmul.f32 %v436_v56, %v225_v3  ;;  %v228_v22 = vmul.f32 %v509_v2, %v645_v30  ;;  %v663_v30 = vstv %s729_s4 }
 0x102   :  { %v513_v19 = vpop.eup %512  ;;  %v223_v20 = vmul.f32 %v511_v15, %v145_v33  ;;  %260 = vadd.xlane.f32.xlu1 %v259_v16  ;;  %v239_v17 = vmul.f32 %v436_v56, %v224_v4  ;;  %v244_v23 = vsel %vm43_vm0, %v236_v14, 0.0  ;;  %v343_v33 = vlaneseq }
 0x103   :  { %v227_v18 = vmul.f32 %v513_v19, %v165_v34  ;;  %v256_v26 = vsel %vm43_vm0, %v240_v24, 0.0  ;;  %v243_v29 = vmul.f32 %v436_v56, %v228_v22 }
 0x104   :  { %v253_v21 = vsel %vm43_vm0, %v239_v17, 0.0  ;;  %v238_v25 = vmul.f32 %v436_v56, %v223_v20  ;;  %v344_v34 = vand.u32 127, %v343_v33  ;;  %v665_v35 = vshrl.u32 %v343_v33, 7 }
 0x105   :  { %245 = vadd.xlane.f32.xlu0 %v244_v23  ;;  %v242_v27 = vmul.f32 %v436_v56, %v227_v18  ;;  %v265_v32 = vsel %vm43_vm0, %v243_v29, 0.0 }
 0x106   :  { %254 = vadd.xlane.f32.xlu1 %v253_v21  ;;  %v250_v28 = vsel %vm43_vm0, %v238_v25, 0.0  ;;  %v377_v36 = vadd.s32 4294967256, %v344_v34  ;;  %v349_v37 = vadd.s32 4294967288, %v344_v34  ;;  %v363_v39 = vadd.s32 4294967272, %v344_v34 }
 0x107   :  { %v262_v31 = vsel %vm43_vm0, %v242_v27, 0.0  ;;  %v356_v42 = vadd.s32 4294967280, %v344_v34  ;;  %v370_v43 = vadd.s32 4294967264, %v344_v34  ;;  %v668_v44 = vadd.s32 4294967240, %v344_v34 }
 0x108   :  { %v380_v45 = vsub.s32 %v377_v36, %v665_v35  ;;  %v384_v47 = vadd.s32 4294967248, %v344_v34  ;;  %v352_v48 = vsub.s32 %v349_v37, %v665_v35  ;;  %v366_v49 = vsub.s32 %v363_v39, %v665_v35 }
 0x109   :  { %257 = vadd.xlane.f32.xlu0 %v256_v26  ;;  %v347_v50 = vsub.s32 %v344_v34, %v665_v35  ;;  %v359_v55 = vsub.s32 %v356_v42, %v665_v35  ;;  %v373_v56 = vsub.s32 %v370_v43, %v665_v35  ;;  %v394_v58 = vsub.s32 %v668_v44, %v665_v35 }
 0x10a   :  { %251 = vadd.xlane.f32.xlu1 %v250_v28 }
 0x10d   :  { %263 = vadd.xlane.f32.xlu0 %v262_v31 }
 0x10e   :  { %266 = vadd.xlane.f32.xlu1 %v265_v32 }
 0x18e   :  { %v249_v38 = vpop.xlane.xlu0 %248 }
 0x18f   :  { %v261_v40 = vpop.xlane.xlu1 %260  ;;  %v271_v41 = vadd.f32 %v663_v30, %v249_v38 }
 0x190   :  { %v275_v46 = vadd.f32 %v663_v30, %v261_v40 }
 0x191   :  { %v279_v52 = vmul.f32 %v271_v41, %v603_v8  ;;  %v387_v8 = vsub.s32 %v384_v47, %v665_v35 }
 0x192   :  { %v246_v51 = vpop.xlane.xlu0 %245  ;;  %v283_v59 = vmul.f32 %v275_v46, %v608_v9  ;;  %v353_v9 = vrot.slane %v271_v41, %v352_v48  ;;  %v381_v14 = vrot.slane %v275_v46, %v380_v45 }
 0x193   :  { %v255_v53 = vpop.xlane.xlu1 %254  ;;  %v270_v54 = vadd.f32 %v663_v30, %v246_v51  ;;  %v287_v63 = vsel %vm43_vm0, %v279_v52, 0.0 }
 0x194   :  { %v273_v57 = vadd.f32 %v663_v30, %v255_v53  ;;  %v305_v7 = vsel %vm43_vm0, %v283_v59, 0.0 }
 0x195   :  { %v278_v60 = vmul.f32 %v270_v54, %v589_v5  ;;  %v348_v61 = vrot.slane %v270_v54, %v347_v50 }
 0x196   :  { %v258_v62 = vpop.xlane.xlu0 %257  ;;  %v281_v0 = vmul.f32 %v273_v57, %v631_v12  ;;  %v367_v15 = vrot.slane %v273_v57, %v366_v49 }
 0x197   :  { %v286_v1 = vsel %vm43_vm0, %v278_v60, 0.0  ;;  %v252_v2 = vpop.xlane.xlu1 %251  ;;  %v274_v3 = vadd.f32 %v663_v30, %v258_v62  ;;  %v355_v20 = vsel %vm354_vm1, %v353_v9, %v348_v61 }
 0x198   :  { %v288_v4 = vadd.f32 %v287_v63, %v286_v1  ;;  %v272_v5 = vadd.f32 %v663_v30, %v252_v2  ;;  %v296_v21 = vsel %vm43_vm0, %v281_v0, 0.0 }
 0x199   :  { %v282_v16 = vmul.f32 %v274_v3, %v594_v6  ;;  %v374_v24 = vrot.slane %v274_v3, %v373_v56 }
 0x19a   :  { %v289_v19 = vrot.slane %v288_v4, 4  ;;  %v280_v12 = vmul.f32 %v272_v5, %v613_v10  ;;  %v360_v17 = vrot.slane %v272_v5, %v359_v55  ;;  %v264_v18 = vpop.xlane.xlu0 %263 }
 0x19b   :  { %v304_v23 = vsel %vm43_vm0, %v282_v16, 0.0  ;;  %v267_v22 = vpop.xlane.xlu1 %266  ;;  %v276_v25 = vadd.f32 %v663_v30, %v264_v18 }
 0x19c   :  { %v290_v26 = vadd.f32 %v289_v19, %v288_v4  ;;  %v295_v27 = vsel %vm43_vm0, %v280_v12, 0.0  ;;  %v362_v6 = vsel %vm361_vm2, %v360_v17, %v355_v20  ;;  %v306_v28 = vadd.f32 %v305_v7, %v304_v23 }
 0x19d   :  { %v297_v29 = vadd.f32 %v296_v21, %v295_v27  ;;  %v369_v31 = vsel %vm368_vm3, %v367_v15, %v362_v6  ;;  %v277_v10 = vadd.f32 %v663_v30, %v267_v22  ;;  %v284_v32 = vmul.f32 %v276_v25, %v618_v11 }
 0x19e   :  { %v291_v33 = vrot.slane %v290_v26, 2  ;;  %v307_v34 = vrot.slane %v306_v28, 4  ;;  %v376_v35 = vsel %vm375_vm4, %v374_v24, %v369_v31  ;;  %v388_v36 = vrot.slane %v276_v25, %v387_v8 }
 0x19f   :  { %v298_v37 = vrot.slane %v297_v29, 4  ;;  %v285_v38 = vmul.f32 %v277_v10, %v636_v13  ;;  %v395_v39 = vrot.slane %v277_v10, %v394_v58  ;;  %v383_v40 = vsel %vm382_vm5, %v381_v14, %v376_v35 }
 0x1a0   :  { %v308_v41 = vadd.f32 %v307_v34, %v306_v28  ;;  %v313_v42 = vsel %vm43_vm0, %v284_v32, 0.0  ;;  %v390_v43 = vsel %vm389_vm6, %v388_v36, %v383_v40  ;;  %v292_v45 = vadd.f32 %v291_v33, %v290_v26 }
 0x1a1   :  { %v299_v44 = vadd.f32 %v298_v37, %v297_v29  ;;  %v314_v30 = vsel %vm43_vm0, %v285_v38, 0.0  ;;  %v397_v11 = vsel %vm396_vm7, %v395_v39, %v390_v43 }
 0x1a2   :  { %v309_v46 = vrot.slane %v308_v41, 2  ;;  %v315_v47 = vadd.f32 %v314_v30, %v313_v42  ;;  %400 = vst.msk [vmem:[%s731_s6] sm:$0x1] %vm399_vm8, %v397_v11  ;;  %v293_v51 = vrot.slane %v292_v45, 1  ;;  %s514_s6 = scalar_lea.vmem %s408_s25, 64 }
 0x1a3   :  { %v300_v13 = vrot.slane %v299_v44, 2  ;;  %p515_p0 = scmp.ne.s32.totalorder %s408_s25, %s514_s6  ;;  %p520_p2 = scmp.lt.s32.totalorder %s514_s6, %s514_s6 }
 0x1a4   :  { %v310_v48 = vadd.f32 %v309_v46, %v308_v41  ;;  %v316_v49 = vrot.slane %v315_v47, 4  ;;  %v294_v57 = vadd.f32 %v293_v51, %v292_v45 }
 0x1a5   :  { %v301_v50 = vadd.f32 %v300_v13, %v299_v44  ;;  %p521_p3 = por %p520_p2, %p519_p1 }
 0x1a6   :  { %v317_v52 = vadd.f32 %v316_v49, %v315_v47  ;;  %v311_v54 = vrot.slane %v310_v48, 1 }
 0x1a7   :  { %v302_v53 = vrot.slane %v301_v50, 1  ;;  %p522_p4 = pnand %p521_p3, %p515_p0 }
 0x1a8   :  { %v318_v55 = vrot.slane %v317_v52, 2  ;;  %v312_v59 = vadd.f32 %v311_v54, %v310_v48 }
 0x1a9   :  { %v303_v56 = vadd.f32 %v302_v53, %v301_v50 }
 0x1aa   :  { %v319_v58 = vadd.f32 %v318_v55, %v317_v52 }
 0x1ab   :  { %v327_v8 = vsel %vm326_vm9, %v303_v56, %v294_v57 }
 0x1ac   :  { %v320_v60 = vrot.slane %v319_v58, 1  ;;  %v329_v62 = vsel %vm328_vm10, %v312_v59, %v327_v8 }
 0x1ae   :  { %v321_v61 = vadd.f32 %v320_v60, %v319_v58 }
 0x1b0   :  { %v331_v63 = vsel %vm330_vm11, %v321_v61, %v329_v62 }
 0x1b1   :  { %334 = vst.msk [vmem:[#allocation3] sm:$0xf] %vm333_vm12, %v331_v63 }
 0x1b2   :  { %525 = shalt.err (!%p522_p4)
}
 0x1b3   :  { %s526_s28 = scalar_lea.hbm %s730_s5, 64 }
 0x1b4   :  { %p527_p5 = scmp.ne.s32.totalorder %s730_s5, %s526_s28  ;;  %p530_p6 = scmp.lt.u32.totalorder %s526_s28, %s730_s5 }
 0x1b6   :  { %p532_p7 = pnand %p530_p6, %p527_p5 }
 0x1b8   :  { %535 = shalt.err (!%p532_p7)
}
 0x1b9   :  { %410 = dma.vmem_to_hbm [thread:$0]  %s408_s25, 64, %s730_s5, [#allocation4]  }
 0x1ba   :  { %536 = dma.done.wait [#allocation4], 64  }
 0x1bb   :  { %537 = vsyncadd [#allocation4], 4294967232 }
 0x1bc   :  { %418 = vsyncpa [#allocation4], 1 }

</bundles_post_ra>
